<compile_context>
chip_gen: v6e
topology: v6e:2x2x1
jax: 0.10.0
libtpu: 0.0.40
codegen_flags: <defaults>
</compile_context>

<pallas_src>
import functools

import jax
import jax.numpy as jnp
from jax.experimental import pallas as pl
from jax.experimental.pallas import tpu as pltpu


def _round_up(x, m):
    return ((x + m - 1) // m) * m


def _complex_conv1x1_kernel(xr_ref, xi_ref, wr_ref, wi_ref, yr_ref, yi_ref):
    """One (batch, spatial-tile) block: y = w @ x (complex, via 4 real matmuls).

    xr/xi_ref : (1, C, tS)  real/imag input planes, spatial on lanes
    wr/wi_ref : (K, C)      real/imag weights
    yr/yi_ref : (1, K, tS)  real/imag output planes (already NCHW layout)
    """
    xr = xr_ref[0]          # (C, tS)
    xi = xi_ref[0]
    wr = wr_ref[...]        # (K, C)
    wi = wi_ref[...]
    # (a + ib)(c + id) = (ac - bd) + i(ad + bc)
    yr_ref[0] = (
        jnp.dot(wr, xr, preferred_element_type=jnp.float32)
        - jnp.dot(wi, xi, preferred_element_type=jnp.float32)
    )
    yi_ref[0] = (
        jnp.dot(wr, xi, preferred_element_type=jnp.float32)
        + jnp.dot(wi, xr, preferred_element_type=jnp.float32)
    )


@functools.partial(jax.jit, static_argnames=("spatial_tile",))
def complex_conv2d_1x1(x, w, *, spatial_tile=4096):
    """Complex 1x1 conv.

    x: complex64 (B, C, H, W)   [NCHW, as in PyTorch]
    w: complex64 (K, C, 1, 1)
    returns: complex64 (B, K, H, W)
    """
    B, C, H, W = x.shape
    K = w.shape[0]
    assert w.shape == (K, C, 1, 1)
    HW = H * W

    # NCHW stays NCHW: just flatten spatial.  Real/imag split is a single XLA
    # pass; no transposes anywhere.
    xc = x.reshape(B, C, HW)
    xr = jnp.real(xc).astype(jnp.float32)
    xi = jnp.imag(xc).astype(jnp.float32)

    w2 = w[:, :, 0, 0]                      # (K, C)
    wr = jnp.real(w2).astype(jnp.float32)
    wi = jnp.imag(w2).astype(jnp.float32)

    # Lane-dense spatial tiling with a zero-padded tail (no divisibility req.).
    assert spatial_tile % 128 == 0
    tS = min(spatial_tile, _round_up(HW, 128))
    S_pad = _round_up(HW, tS)
    if S_pad != HW:
        pad = ((0, 0), (0, 0), (0, S_pad - HW))
        xr = jnp.pad(xr, pad)
        xi = jnp.pad(xi, pad)

    grid = (B, S_pad // tS)

    x_spec = pl.BlockSpec((1, C, tS), lambda b, s: (b, 0, s))
    w_spec = pl.BlockSpec((K, C), lambda b, s: (0, 0))
    y_spec = pl.BlockSpec((1, K, tS), lambda b, s: (b, 0, s))

    yr, yi = pl.pallas_call(
        _complex_conv1x1_kernel,
        out_shape=(
            jax.ShapeDtypeStruct((B, K, S_pad), jnp.float32),
            jax.ShapeDtypeStruct((B, K, S_pad), jnp.float32),
        ),
        grid_spec=pltpu.PrefetchScalarGridSpec(
            num_scalar_prefetch=0,
            grid=grid,
            in_specs=[x_spec, x_spec, w_spec, w_spec],
            out_specs=[y_spec, y_spec],
        ),
        compiler_params=pltpu.CompilerParams(
            # Both axes are independent -> megacore sharding on v7x is real work.
            dimension_semantics=("parallel", "parallel"),
        ),
    )(xr, xi, wr, wi)

    yr = yr[:, :, :HW]
    yi = yi[:, :, :HW]
    y = jax.lax.complex(yr, yi).reshape(B, K, H, W)
    return y


def unitary_init(key, out_channels, in_channels):
    """Deterministic 'unitary' init: columns of w[:, :, 0, 0] are orthonormal.

    Mirrors the module's unitary_init for shape (K, C, 1, 1), K >= C.
    """
    kr, ki = jax.random.split(key)
    a = (
        jax.random.normal(kr, (out_channels, in_channels), dtype=jnp.float32)
        + 1j * jax.random.normal(ki, (out_channels, in_channels), dtype=jnp.float32)
    ).astype(jnp.complex64)
    q, _ = jnp.linalg.qr(a)  # (K, C), columns orthonormal
    return q.reshape(out_channels, in_channels, 1, 1)


class ComplexConv2dPallas:
    """JAX/Pallas equivalent of ComplexConv2d (complex weights, kernel_size=1)."""

    def __init__(self, key, in_channels, out_channels, kernel_size=1):
        assert kernel_size == 1
        self.in_channels = in_channels
        self.out_channels = out_channels
        self.kernel_size = kernel_size
        # stored as complex; the PyTorch module stores view_as_real(param) but
        # views it back to complex in forward — numerically identical.
        # TODO(synk): parseval/quadrature regularization flags are training-time
        # concerns and do not affect the forward pass.
        self.param = unitary_init(key, out_channels, in_channels)

    def __call__(self, x):
        if self.out_channels == 0:
            return x[:, 0:0].astype(jnp.complex64)
        # mirror conv2d()'s real_to_complex handling
        if jnp.iscomplexobj(x):
            xc = x
        elif x.ndim == 5:
            xc = jax.lax.complex(x[..., 0], x[..., 1])
        else:
            xc = x.astype(jnp.complex64)
        return complex_conv2d_1x1(xc, self.param)


if __name__ == "__main__":
    key = jax.random.PRNGKey(0)
    k_x, k_w = jax.random.split(key)

    B, C, H, W = 2, 4, 16, 16
    K = 8

    xr_ = jax.random.normal(k_x, (B, C, H, W), dtype=jnp.float32)
    xi_ = jax.random.normal(jax.random.fold_in(k_x, 1), (B, C, H, W), dtype=jnp.float32)
    x = (xr_ + 1j * xi_).astype(jnp.complex64)

    module = ComplexConv2dPallas(k_w, in_channels=C, out_channels=K, kernel_size=1)

    y = module(x)
    y = jax.block_until_ready(y)

    # Reference check (plain JAX complex einsum == F.conv2d with 1x1 complex kernel).
    w2d = module.param[:, :, 0, 0]  # (K, C)
    y_ref = jnp.einsum("kc,bchw->bkhw", w2d, x)
    assert y.shape == (B, K, H, W)
    assert y.dtype == jnp.complex64
    assert jnp.allclose(y, y_ref, atol=1e-4, rtol=1e-4)

    # Second check: non-lane-aligned spatial size exercises the padded tail path.
    H2, W2 = 5, 7
    xr2 = jax.random.normal(jax.random.fold_in(k_x, 2), (B, C, H2, W2), dtype=jnp.float32)
    xi2 = jax.random.normal(jax.random.fold_in(k_x, 3), (B, C, H2, W2), dtype=jnp.float32)
    x2 = (xr2 + 1j * xi2).astype(jnp.complex64)
    y2 = jax.block_until_ready(module(x2))
    y2_ref = jnp.einsum("kc,bchw->bkhw", w2d, x2)
    assert y2.shape == (B, K, H2, W2)
    assert jnp.allclose(y2, y2_ref, atol=1e-4, rtol=1e-4)

    print("KERNEL_OK")
</pallas_src>

<mosaic_0001>
module attributes {stable_mosaic.version = 11 : i64} {
  func.func @_complex_conv1x1_kernel(%arg0: i32, %arg1: i32, %arg2: memref<1x4x256xf32, #tpu.memory_space<vmem>>, %arg3: memref<1x4x256xf32, #tpu.memory_space<vmem>>, %arg4: memref<8x4xf32, #tpu.memory_space<vmem>>, %arg5: memref<8x4xf32, #tpu.memory_space<vmem>>, %arg6: memref<1x8x256xf32, #tpu.memory_space<vmem>>, %arg7: memref<1x8x256xf32, #tpu.memory_space<vmem>>) attributes {dimension_semantics = [#tpu.dimension_semantics<parallel>, #tpu.dimension_semantics<parallel>], iteration_bounds = array<i64: 2, 1>, scalar_prefetch = 0 : i64, scratch_operands = 0 : i64, tpu.core_type = #tpu.core_type<tc>, window_params = [{transform_indices = @transform_0, window_bounds = array<i64: 1, 4, 256>}, {transform_indices = @transform_1, window_bounds = array<i64: 1, 4, 256>}, {pipeline_mode = #tpu.pipeline_mode<synchronous>, transform_indices = @transform_2, window_bounds = array<i64: 8, 4>}, {pipeline_mode = #tpu.pipeline_mode<synchronous>, transform_indices = @transform_3, window_bounds = array<i64: 8, 4>}, {transform_indices = @transform_4, window_bounds = array<i64: 1, 8, 256>}, {transform_indices = @transform_5, window_bounds = array<i64: 1, 8, 256>}]} {
    %c0 = arith.constant 0 : index
    %c0_0 = arith.constant 0 : index
    %c0_1 = arith.constant 0 : index
    %0 = vector.load %arg2[%c0, %c0_0, %c0_1] : memref<1x4x256xf32, #tpu.memory_space<vmem>>, vector<1x4x256xf32>
    %1 = vector.shape_cast %0 : vector<1x4x256xf32> to vector<4x256xf32>
    %c0_2 = arith.constant 0 : index
    %c0_3 = arith.constant 0 : index
    %c0_4 = arith.constant 0 : index
    %2 = vector.load %arg3[%c0_2, %c0_3, %c0_4] : memref<1x4x256xf32, #tpu.memory_space<vmem>>, vector<1x4x256xf32>
    %3 = vector.shape_cast %2 : vector<1x4x256xf32> to vector<4x256xf32>
    %c0_5 = arith.constant 0 : index
    %c0_6 = arith.constant 0 : index
    %4 = vector.load %arg4[%c0_5, %c0_6] : memref<8x4xf32, #tpu.memory_space<vmem>>, vector<8x4xf32>
    %c0_7 = arith.constant 0 : index
    %c0_8 = arith.constant 0 : index
    %5 = vector.load %arg5[%c0_7, %c0_8] : memref<8x4xf32, #tpu.memory_space<vmem>>, vector<8x4xf32>
    %cst = arith.constant dense<0.000000e+00> : vector<8x256xf32>
    %6 = tpu.matmul %4, %1, %cst {dimension_numbers = #tpu.dot_dimension_numbers<[1], [0], [0], [1], [0, 0, 1, 1], [], []>} : vector<8x4xf32>, vector<4x256xf32>, vector<8x256xf32> -> vector<8x256xf32>
    %cst_9 = arith.constant dense<0.000000e+00> : vector<8x256xf32>
    %7 = tpu.matmul %5, %3, %cst_9 {dimension_numbers = #tpu.dot_dimension_numbers<[1], [0], [0], [1], [0, 0, 1, 1], [], []>} : vector<8x4xf32>, vector<4x256xf32>, vector<8x256xf32> -> vector<8x256xf32>
    %8 = arith.subf %6, %7 : vector<8x256xf32>
    %c0_10 = arith.constant 0 : index
    %c0_11 = arith.constant 0 : index
    %c0_12 = arith.constant 0 : index
    %9 = vector.load %arg6[%c0_10, %c0_11, %c0_12] : memref<1x8x256xf32, #tpu.memory_space<vmem>>, vector<1x8x256xf32>
    %10 = vector.shape_cast %9 : vector<1x8x256xf32> to vector<8x256xf32>
    %11 = vector.shape_cast %8 : vector<8x256xf32> to vector<1x8x256xf32>
    tpu.vector_store %arg6[%c0_10, %c0_11, %c0_12], %11 {strides = array<i32>} : memref<1x8x256xf32, #tpu.memory_space<vmem>>, vector<1x8x256xf32>,
    %cst_13 = arith.constant dense<0.000000e+00> : vector<8x256xf32>
    %12 = tpu.matmul %4, %3, %cst_13 {dimension_numbers = #tpu.dot_dimension_numbers<[1], [0], [0], [1], [0, 0, 1, 1], [], []>} : vector<8x4xf32>, vector<4x256xf32>, vector<8x256xf32> -> vector<8x256xf32>
    %cst_14 = arith.constant dense<0.000000e+00> : vector<8x256xf32>
    %13 = tpu.matmul %5, %1, %cst_14 {dimension_numbers = #tpu.dot_dimension_numbers<[1], [0], [0], [1], [0, 0, 1, 1], [], []>} : vector<8x4xf32>, vector<4x256xf32>, vector<8x256xf32> -> vector<8x256xf32>
    %14 = arith.addf %12, %13 : vector<8x256xf32>
    %c0_15 = arith.constant 0 : index
    %c0_16 = arith.constant 0 : index
    %c0_17 = arith.constant 0 : index
    %15 = vector.load %arg7[%c0_15, %c0_16, %c0_17] : memref<1x8x256xf32, #tpu.memory_space<vmem>>, vector<1x8x256xf32>
    %16 = vector.shape_cast %15 : vector<1x8x256xf32> to vector<8x256xf32>
    %17 = vector.shape_cast %14 : vector<8x256xf32> to vector<1x8x256xf32>
    tpu.vector_store %arg7[%c0_15, %c0_16, %c0_17], %17 {strides = array<i32>} : memref<1x8x256xf32, #tpu.memory_space<vmem>>, vector<1x8x256xf32>,
    return
  }
  func.func @transform_0(%arg0: i32, %arg1: i32) -> (i32, i32, i32) {
    %c0_i32 = arith.constant 0 : i32
    %c0_i32_0 = arith.constant 0 : i32
    return %arg0, %c0_i32, %arg1 : i32, i32, i32
  }
  func.func @transform_1(%arg0: i32, %arg1: i32) -> (i32, i32, i32) {
    %c0_i32 = arith.constant 0 : i32
    %c0_i32_0 = arith.constant 0 : i32
    return %arg0, %c0_i32, %arg1 : i32, i32, i32
  }
  func.func @transform_2(%arg0: i32, %arg1: i32) -> (i32, i32) {
    %c0_i32 = arith.constant 0 : i32
    %c0_i32_0 = arith.constant 0 : i32
    %c0_i32_1 = arith.constant 0 : i32
    return %c0_i32, %c0_i32_0 : i32, i32
  }
  func.func @transform_3(%arg0: i32, %arg1: i32) -> (i32, i32) {
    %c0_i32 = arith.constant 0 : i32
    %c0_i32_0 = arith.constant 0 : i32
    %c0_i32_1 = arith.constant 0 : i32
    return %c0_i32, %c0_i32_0 : i32, i32
  }
  func.func @transform_4(%arg0: i32, %arg1: i32) -> (i32, i32, i32) {
    %c0_i32 = arith.constant 0 : i32
    %c0_i32_0 = arith.constant 0 : i32
    return %arg0, %c0_i32, %arg1 : i32, i32, i32
  }
  func.func @transform_5(%arg0: i32, %arg1: i32) -> (i32, i32, i32) {
    %c0_i32 = arith.constant 0 : i32
    %c0_i32_0 = arith.constant 0 : i32
    return %arg0, %c0_i32, %arg1 : i32, i32, i32
  }
}

</mosaic_0001>

<bundles_post_ra>
// kernel: custom-call.2
= control target key start
LH: loop header
LB: loop body
LE: loop exit
PB: predicated region body
PF: predicated region fallthrough
CT: control target
= control target key end

     0   :  { %2 = vsyncpa [#allocation0], 0  ;;  %s47_s0 = inlined_call_operand.hbm [shape: c64[8,4,1,1], index: 0, kind: input, shape index: {}]   ;;  %s48_s1 = inlined_call_operand.vmem [shape: f32[8,4,1,1], index: 1, kind: output, shape index: {}]  }
   0x1   :  { %s3_s8 = sshll.u32 %s48_s1, 4  ;;  %s4_s8 = int_to_ptr.vmem [resolvable:$true] %s3_s8 }
   0x2   :  { %s17_s9 = scalar_lea.vmem %s4_s8, 64  ;;  %p22_p1 = scmp.lt.s32.totalorder %s4_s8, %s4_s8 }
   0x3   :  { %p18_p0 = scmp.ne.s32.totalorder %s4_s8, %s17_s9  ;;  %p23_p2 = scmp.lt.s32.totalorder %s17_s9, %s17_s9 }
   0x5   :  { %p24_p3 = por %p23_p2, %p22_p1 }
   0x7   :  { %p25_p4 = pnand %p24_p3, %p18_p0 }
   0x9   :  { %28 = shalt.err (!%p25_p4)  }
   0xa   :  { %6 = dma.hbm_to_vmem [thread:$0]  %s47_s0, 64, %s4_s8, [#allocation0] }
   0xb   :  { %29 = dma.done.wait [#allocation0], 64  }
   0xc   :  { %30 = vsyncadd [#allocation0], 4294967232 }
   0xd   :  { %8 = vsyncpa [#allocation0], 1 }

// kernel: custom-call.1
= control target key start
LH: loop header
LB: loop body
LE: loop exit
PB: predicated region body
PF: predicated region fallthrough
CT: control target
= control target key end

     0   :  { %s51_s0 = inlined_call_operand.hbm [shape: c64[2,4,16,16], index: 0, kind: input, shape index: {}]   ;;  %s52_s1 = inlined_call_operand.vmem [shape: f32[2,4,16,16], index: 1, kind: output, shape index: {}]  }
   0x1   :  { %s2_s8 = scalar_lea.hbm %s51_s0, 2048 }
   0x2   :  { %3 = vsyncpa [#allocation0], 0  ;;  %s4_s11 = sshll.u32 %s52_s1, 4  ;;  %s5_s11 = int_to_ptr.vmem [resolvable:$true] %s4_s11 }
   0x3   :  { %s20_s12 = scalar_lea.vmem %s5_s11, 2048  ;;  %p25_p1 = scmp.lt.s32.totalorder %s5_s11, %s5_s11 }
   0x4   :  { %p21_p0 = scmp.ne.s32.totalorder %s5_s11, %s20_s12  ;;  %p26_p2 = scmp.lt.s32.totalorder %s20_s12, %s20_s12 }
   0x6   :  { %p27_p3 = por %p26_p2, %p25_p1 }
   0x8   :  { %p28_p4 = pnand %p27_p3, %p21_p0 }
   0xa   :  { %31 = shalt.err (!%p28_p4)  }
   0xb   :  { %7 = dma.hbm_to_vmem [thread:$0]  %s2_s8, 2048, %s5_s11, [#allocation0] }
   0xc   :  { %33 = dma.done.wait [#allocation0], 2048  }
   0xd   :  { %34 = vsyncadd [#allocation0], 4294965248 }
   0xe   :  { %9 = vsyncpa [#allocation0], 1 }

// kernel: custom-call.3
= control target key start
LH: loop header
LB: loop body
LE: loop exit
PB: predicated region body
PF: predicated region fallthrough
CT: control target
= control target key end

     0   :  { %s51_s0 = inlined_call_operand.hbm [shape: c64[8,4,1,1], index: 0, kind: input, shape index: {}]   ;;  %s52_s1 = inlined_call_operand.vmem [shape: f32[8,4,1,1], index: 1, kind: output, shape index: {}]  }
   0x1   :  { %s2_s8 = scalar_lea.hbm %s51_s0, 64 }
   0x2   :  { %3 = vsyncpa [#allocation0], 0  ;;  %s4_s11 = sshll.u32 %s52_s1, 4  ;;  %s5_s11 = int_to_ptr.vmem [resolvable:$true] %s4_s11 }
   0x3   :  { %s20_s12 = scalar_lea.vmem %s5_s11, 64  ;;  %p25_p1 = scmp.lt.s32.totalorder %s5_s11, %s5_s11 }
   0x4   :  { %p21_p0 = scmp.ne.s32.totalorder %s5_s11, %s20_s12  ;;  %p26_p2 = scmp.lt.s32.totalorder %s20_s12, %s20_s12 }
   0x6   :  { %p27_p3 = por %p26_p2, %p25_p1 }
   0x8   :  { %p28_p4 = pnand %p27_p3, %p21_p0 }
   0xa   :  { %31 = shalt.err (!%p28_p4)  }
   0xb   :  { %7 = dma.hbm_to_vmem [thread:$0]  %s2_s8, 64, %s5_s11, [#allocation0] }
   0xc   :  { %33 = dma.done.wait [#allocation0], 64  }
   0xd   :  { %34 = vsyncadd [#allocation0], 4294967232 }
   0xe   :  { %9 = vsyncpa [#allocation0], 1 }

// kernel: custom-call
= control target key start
LH: loop header
LB: loop body
LE: loop exit
PB: predicated region body
PF: predicated region fallthrough
CT: control target
= control target key end

     0   :  { %2 = vsyncpa [#allocation0], 0  ;;  %s47_s0 = inlined_call_operand.hbm [shape: c64[2,4,16,16], index: 0, kind: input, shape index: {}]   ;;  %s48_s1 = inlined_call_operand.vmem [shape: f32[2,4,16,16], index: 1, kind: output, shape index: {}]  }
   0x1   :  { %s3_s8 = sshll.u32 %s48_s1, 4  ;;  %s4_s8 = int_to_ptr.vmem [resolvable:$true] %s3_s8 }
   0x2   :  { %s17_s9 = scalar_lea.vmem %s4_s8, 2048  ;;  %p22_p1 = scmp.lt.s32.totalorder %s4_s8, %s4_s8 }
   0x3   :  { %p18_p0 = scmp.ne.s32.totalorder %s4_s8, %s17_s9  ;;  %p23_p2 = scmp.lt.s32.totalorder %s17_s9, %s17_s9 }
   0x5   :  { %p24_p3 = por %p23_p2, %p22_p1 }
   0x7   :  { %p25_p4 = pnand %p24_p3, %p18_p0 }
   0x9   :  { %28 = shalt.err (!%p25_p4)  }
   0xa   :  { %6 = dma.hbm_to_vmem [thread:$0]  %s47_s0, 2048, %s4_s8, [#allocation0] }
   0xb   :  { %29 = dma.done.wait [#allocation0], 2048  }
   0xc   :  { %30 = vsyncadd [#allocation0], 4294965248 }
   0xd   :  { %8 = vsyncpa [#allocation0], 1 }

// kernel: custom-call.4
= control target key start
LH: loop header
LB: loop body
LE: loop exit
PB: predicated region body
PF: predicated region fallthrough
CT: control target
= control target key end

     0   :  { %s92_s0 = inlined_call_operand.vmem [shape: f32[2,8,16,16], index: 0, kind: input, shape index: {}]   ;;  %s93_s1 = inlined_call_operand.vmem [shape: f32[2,8,16,16], index: 1, kind: input, shape index: {}]   ;;  %s94_s2 = inlined_call_operand.hbm [shape: c64[2,8,16,16], index: 2, kind: output, shape index: {}]  }
   0x1   :  { %s3_s11 = scalar_lea.hbm %s94_s2, 4096 }
   0x2   :  { %4 = vsyncpa [#allocation0], 0  ;;  %s5_s14 = sshll.u32 %s92_s0, 4  ;;  %s6_s14 = int_to_ptr.vmem [resolvable:$true] %s5_s14 }
   0x3   :  { %s18_s15 = scalar_lea.vmem %s6_s14, 4096  ;;  %p23_p1 = scmp.lt.s32.totalorder %s6_s14, %s6_s14 }
   0x4   :  { %p19_p0 = scmp.ne.s32.totalorder %s6_s14, %s18_s15  ;;  %p24_p2 = scmp.lt.s32.totalorder %s18_s15, %s18_s15 }
   0x6   :  { %p25_p3 = por %p24_p2, %p23_p1 }
   0x8   :  { %p26_p4 = pnand %p25_p3, %p19_p0 }
   0xa   :  { %29 = shalt.err (!%p26_p4)  }
   0xb   :  { %8 = dma.vmem_to_hbm [thread:$0]  %s6_s14, 4096, %s94_s2, [#allocation0] }
   0xc   :  { %61 = dma.done.wait [#allocation0], 4096  }
   0xd   :  { %62 = vsyncadd [#allocation0], 4294963200 }
   0xe   :  { %10 = vsyncpa [#allocation0], 1 }
   0xf   :  { %11 = vsyncpa [#allocation1], 0  ;;  %s12_s0 = sshll.u32 %s93_s1, 4  ;;  %s13_s0 = int_to_ptr.vmem [resolvable:$true] %s12_s0 }
  0x10   :  { %s38_s20 = scalar_lea.vmem %s13_s0, 4096  ;;  %p43_p6 = scmp.lt.s32.totalorder %s13_s0, %s13_s0 }
  0x11   :  { %p39_p5 = scmp.ne.s32.totalorder %s13_s0, %s38_s20  ;;  %p44_p7 = scmp.lt.s32.totalorder %s38_s20, %s38_s20 }
  0x13   :  { %p45_p8 = por %p44_p7, %p43_p6 }
  0x15   :  { %p46_p9 = pnand %p45_p8, %p39_p5 }
  0x17   :  { %49 = shalt.err (!%p46_p9)  }
  0x18   :  { %15 = dma.vmem_to_hbm [thread:$0]  %s13_s0, 4096, %s3_s11, [#allocation1] }
  0x19   :  { %63 = dma.done.wait [#allocation1], 4096  }
  0x1a   :  { %64 = vsyncadd [#allocation1], 4294963200 }
  0x1b   :  { %17 = vsyncpa [#allocation1], 1 }

// kernel: complex_conv2d_1x1.1
= control target key start
LH: loop header
LB: loop body
LE: loop exit
PB: predicated region body
PF: predicated region fallthrough
CT: control target
= control target key end

     0   :  { %s906_s18 = smov 0   ;;  %s908_s19 = smov 0   ;;  %s963_s0 = inlined_call_operand.vmem [shape: f32[2,4,256], index: 0, kind: input, shape index: {}]   ;;  %s964_s1 = inlined_call_operand.vmem [shape: f32[2,4,256], index: 1, kind: input, shape index: {}]   ;;  %s965_s2 = inlined_call_operand.vmem [shape: f32[8,4], index: 2, kind: input, shape index: {}]   ;;  %s966_s3 = inlined_call_operand.vmem [shape: f32[8,4], index: 3, kind: input, shape index: {}]   ;;  %s967_s4 = inlined_call_operand.vmem [shape: f32[2,8,256], index: 4, kind: output, shape index: {0}]   ;;  %s968_s5 = inlined_call_operand.vmem [shape: f32[2,8,256], index: 5, kind: output, shape index: {1}]  }
   0x1   :  { %s910_s20 = smov 0  }
   0x2 LB: > { %s28_s21 = sadd.s32 1, %s869_s19  ;;  %p797_p0 = scmp.ge.s32.totalorder %s873_s20, 1  ;;  %s873_s20 = sphi %s910_s20, %s16_s20   ;;  %s869_s19 = sphi %s908_s19, %s970_s19   ;;  %s865_s18 = sphi %s906_s18, %s969_s18  }
   0x3   : > { %p30_p1 = scmp.ge.s32.totalorder %s28_s21, 2  ;;  %p230_p2 = scmp.lt.s32.totalorder %s873_s20, 3 }
   0x5   : > { %s972_s21 = smov (%p30_p1, %s28_s21), 0  ;;  %p231_p3 = pnand %p797_p0, %p230_p2 }
   0x6   : > { %p285_p4 = scmp.lt.s32.totalorder (!%p231_p3), %s865_s18, 1 }
   0x7   : > { %234 = sbr.rel (%p231_p3) target bundleno = 223 (0xdf), region = 36 }
   0xc   : > { %v875_v0 = vmov 0.0   ;;  %s974_s18 = smov (!%p285_p4, %s865_s18), 1  ;;  %vm334_vm0 = vcmask 1043456   ;;  %v326_v5 = vld [vmem:[%s965_s2] sm:$0xff]  ;;  %vm330_vm1 = vcmask 31744  }
   0xd   : > { %403 = vmatprep.mubr.f32.mxu0 %v875_v0  ;;  %483 = vmatprep.mubr.f32.mxu1 %v875_v0  ;;  %s820_s22 = sshll.u32 %s974_s18, 3  ;;  %v327_v6 = vld [vmem:[%s966_s3] sm:$0xff]  ;;  %s822_s8 = sshll.u32 %s974_s18, 4 }
   0xe   : > { %s292_s25 = scalar_lea.vmem %s963_s0, %s820_s22  ;;  %s302_s28 = scalar_lea.vmem %s964_s1, %s820_s22 }
   0xf   : > { %v324_v1 = vld [vmem:[%s292_s25] sm:$0xff]  ;;  %s312_s11 = scalar_lea.vmem %s967_s4, %s822_s8  ;;  %s322_s14 = scalar_lea.vmem %s968_s5, %s822_s8 }
  0x10   : > { %v325_v2 = vld [vmem:[%s302_s28] sm:$0xff]  ;;  %v329_v3 = vcombine.high %v324_v1, %v324_v1 }
  0x11   : > { %v411_v4 = vcombine.high %v325_v2, %v325_v2 }
  0x12   : > { %806 = vmatprep.subr.msk.mxu0 %vm334_vm0, %v329_v3 }
  0x13   : > { %809 = vmatprep.subr.msk.mxu1 %vm334_vm0, %v411_v4  ;;  %807 = vmatpush1.msk.msra.mxu0 %vm334_vm0, %v324_v1 }
  0x14   : > { %810 = vmatpush1.msk.msra.mxu1 %vm334_vm0, %v325_v2  ;;  %808 = vmatmul.mubr.msk.f32.vlgmr.msra.gmra.mxu0 %vm330_vm1, %v326_v5 }
  0x15   : > { %811 = vmatmul.mubr.msk.f32.vlgmr.msra.gmra.mxu1 %vm330_vm1, %v327_v6  ;;  %812 = vmatprep.subr.msk.mxu0 %vm334_vm0, %v329_v3 }
  0x16   : > { %815 = vmatprep.subr.msk.mxu1 %vm334_vm0, %v411_v4  ;;  %813 = vmatpush1.msk.msra.mxu0 %vm334_vm0, %v324_v1 }
  0x17   : > { %816 = vmatpush1.msk.msra.mxu1 %vm334_vm0, %v325_v2  ;;  %558 = vmatprep.mubr.f32.mxu0 %v875_v0 }
  0x18   : > { %629 = vmatprep.mubr.f32.mxu1 %v875_v0  ;;  %814 = vmatmul.mubr.msk.f32.vlgmr.msra.gmra.mxu0 %vm330_vm1, %v327_v6 }
  0x19   : > { %817 = vmatmul.mubr.msk.f32.vlgmr.msra.gmra.mxu1 %vm330_vm1, %v326_v5 }
  0xd4   : > { %v405_v7 = vpop.f32.mrf.mxu0 }
  0xd5   : > { %v485_v8 = vpop.f32.mrf.mxu1 }
  0xd6   : > { %v490_v9 = vsub.f32 %v405_v7, %v485_v8  ;;  %v407_v10 = vpop.f32.mrf.mxu0 }
  0xd7   : > { %v487_v11 = vpop.f32.mrf.mxu1 }
  0xd8   : > { %492 = vst [vmem:[%s312_s11] sm:$0xff] %v490_v9  ;;  %v491_v12 = vsub.f32 %v407_v10, %v487_v11  ;;  %v560_v13 = vpop.f32.mrf.mxu0 }
  0xd9   : > { %v631_v14 = vpop.f32.mrf.mxu1 }
  0xda   : > { %493 = vst [vmem:[%s312_s11 + $0x8] sm:$0xff] %v491_v12  ;;  %v632_v15 = vadd.f32 %v631_v14, %v560_v13  ;;  %v562_v16 = vpop.f32.mrf.mxu0 }
  0xdb   : > { %v633_v17 = vpop.f32.mrf.mxu1 }
  0xdc   : > { %636 = vst [vmem:[%s322_s14] sm:$0xff] %v632_v15  ;;  %v634_v18 = vadd.f32 %v633_v17, %v562_v16 }
  0xde   : > { %637 = vst [vmem:[%s322_s14 + $0x8] sm:$0xff] %v634_v18 }
  0xdf PF: > { %s16_s20 = sadd.s32 1, %s873_s20   ;;  %s969_s18 = smov %s869_s19 }
  0xe0   : > { %p13_p5 = scmp.ge.s32.totalorder %s16_s20, 4   ;;  %s970_s19 = smov %s972_s21 }
  0xe2   :  { %15 = sbr.rel (!%p13_p5) target bundleno = 2 (0x2), region = 81 }

</bundles_post_ra>
